<compile_context>
chip_gen: v5e
topology: v5e:2x2
jax: 0.10.0
libtpu: 0.0.40
codegen_flags: <defaults>
</compile_context>

<pallas_src>
import functools

import jax
import jax.numpy as jnp
from jax.experimental import pallas as pl
from jax.experimental.pallas import tpu as pltpu


# --------------------------------------------------------------------------------------------
# Generic multi-head GAT layer kernel (flash-style over the neighbour axis)
# --------------------------------------------------------------------------------------------
def gat_layer_kernel(x_q_ref, x_k_ref, w_aug_ref, adj_ref, o_ref,
                     fdst_ref, m_ref, l_ref, acc_ref,
                     *, n_heads, d_head, alpha, apply_elu):
    """One multi-head GAT layer.

    Grid: (query_tiles [parallel], neighbour_tiles [arbitrary]).
      x_q_ref : (tq, F_in)          bf16  query rows of the node features
      x_k_ref : (tk, F_in)          bf16  neighbour rows of the node features
      w_aug   : (F_in, H*D + 2H)    bf16  [heads-concat W | W_h@a_dst_h | W_h@a_src_h]
      adj_ref : (tq, tk)            int8  adj[i, j] != 0 iff edge j -> i (self loops included)
      o_ref   : (tq, H*D)                 written once, at the last neighbour tile
    """
    H, D = n_heads, d_head
    ki = pl.program_id(1)
    NEG = jnp.float32(-1e30)              # finite sentinel -> no inf/NaN anywhere

    @pl.when(ki == 0)
    def _init():
        # Per-query-tile state: f_dst_i = a_dst . W h_i (all heads in one MXU contraction)
        z_q = jnp.dot(x_q_ref[...], w_aug_ref[...], preferred_element_type=jnp.float32)
        fdst_ref[...] = z_q[:, H * D:H * D + H]                       # (tq, H)
        m_ref[...] = jnp.full(m_ref.shape, NEG, jnp.float32)
        l_ref[...] = jnp.zeros_like(l_ref)
        acc_ref[...] = jnp.zeros_like(acc_ref)

    mask = adj_ref[...].astype(jnp.float32) > 0.0                      # (tq, tk)

    # Neighbour-side projection: one bf16 MXU contraction gives all head outputs + f_src cols.
    z_k = jnp.dot(x_k_ref[...], w_aug_ref[...], preferred_element_type=jnp.float32)
    wh_k = z_k[:, :H * D].astype(jnp.bfloat16)                         # (tk, H*D)
    fsrc_t = jnp.transpose(z_k[:, H * D + H:H * D + 2 * H])            # (H, tk) one tiny XLU move
    fdst = fdst_ref[...]                                               # (tq, H)

    for h in range(H):                                                 # static unroll, H small
        e = fdst[:, h:h + 1] + fsrc_t[h:h + 1, :]                      # (tq, tk)
        e = jnp.where(e > 0, e, alpha * e)                             # LeakyReLU(alpha)
        e = jnp.where(mask, e, NEG)
        m_old = m_ref[h]                                               # (tq, 1)
        m_new = jnp.maximum(m_old, jnp.max(e, axis=-1, keepdims=True))
        p = jnp.where(mask, jnp.exp(e - m_new), 0.0)                   # unnormalised probs
        scale = jnp.exp(m_old - m_new)                                 # rescale of earlier tiles
        l_ref[h] = scale * l_ref[h] + jnp.sum(p, axis=-1, keepdims=True)
        acc_ref[h] = scale * acc_ref[h] + jnp.dot(
            p.astype(jnp.bfloat16), wh_k[:, h * D:(h + 1) * D],
            preferred_element_type=jnp.float32)
        m_ref[h] = m_new

    @pl.when(ki == pl.num_programs(1) - 1)
    def _finalize():
        for h in range(H):
            inv_l = pl.reciprocal(l_ref[h], approx=True)               # EUP; self loops => l > 0
            out_h = acc_ref[h] * inv_l                                 # (tq, D)
            if apply_elu:
                # ELU with the negative branch clamped so exp never overflows on discarded lanes
                out_h = jnp.where(out_h > 0, out_h, jnp.exp(jnp.minimum(out_h, 0.0)) - 1.0)
            o_ref[:, h * D:(h + 1) * D] = out_h.astype(o_ref.dtype)


def _tile(n, pref):
    # TODO(synk): ragged tails (N not a multiple of the preferred tile) need masked boundary
    # blocks; demo shapes use a single full-extent block so this simple rule suffices.
    if n <= pref or n % pref != 0:
        return n
    return pref


def gat_layer(x, adj_i8, w_aug, *, n_heads, d_head, alpha, apply_elu, out_dtype,
              tile_q=256, tile_k=512):
    """Run one multi-head GAT layer. x: (N, F_in) bf16, adj_i8: (N, N) int8, w_aug folded weights."""
    N, F_in = x.shape
    H, D = n_heads, d_head
    assert w_aug.shape == (F_in, H * D + 2 * H)

    tq = _tile(N, tile_q)
    tk = _tile(N, tile_k)
    grid = (N // tq, N // tk)
    gq, gk = grid

    kernel = functools.partial(gat_layer_kernel, n_heads=H, d_head=D,
                               alpha=float(alpha), apply_elu=apply_elu)

    flops = int(2 * N * F_in * (H * D + 2 * H) * (gq + 1)       # projections (neighbour side per q-tile)
                + H * (2 * N * N * D + 6 * N * N))              # attention matmuls + softmax arith
    transcendentals = int(2 * H * N * N)                        # exp(e - m) + rescale exp
    bytes_accessed = int(N * F_in * x.dtype.itemsize * (1 + gq)
                         + N * N * adj_i8.dtype.itemsize
                         + w_aug.size * w_aug.dtype.itemsize
                         + N * H * D * jnp.dtype(out_dtype).itemsize)

    return pl.pallas_call(
        kernel,
        out_shape=jax.ShapeDtypeStruct((N, H * D), out_dtype),
        grid=grid,
        in_specs=[
            pl.BlockSpec((tq, F_in), lambda qi, ki: (qi, 0)),             # query rows of x
            pl.BlockSpec((tk, F_in), lambda qi, ki: (ki, 0)),             # neighbour rows of x
            pl.BlockSpec((F_in, H * D + 2 * H), lambda qi, ki: (0, 0)),   # augmented weights
            pl.BlockSpec((tq, tk), lambda qi, ki: (qi, ki)),              # adjacency block (int8)
        ],
        out_specs=pl.BlockSpec((tq, H * D), lambda qi, ki: (qi, 0)),
        scratch_shapes=[
            pltpu.VMEM((tq, H), jnp.float32),       # f_dst (per query row, per head)
            pltpu.VMEM((H, tq, 1), jnp.float32),    # online-softmax running max
            pltpu.VMEM((H, tq, 1), jnp.float32),    # online-softmax running denominator
            pltpu.VMEM((H, tq, D), jnp.float32),    # online-softmax running numerator
        ],
        compiler_params=pltpu.CompilerParams(
            dimension_semantics=("parallel", "arbitrary"),
            vmem_limit_bytes=48 * 1024 * 1024),     # safe on v5e/v6e (128 MiB) and v7x (64 MiB)
        cost_estimate=pl.CostEstimate(flops=flops, transcendentals=transcendentals,
                                      bytes_accessed=bytes_accessed),
    )(x, x, w_aug, adj_i8)


# --------------------------------------------------------------------------------------------
# NodeModel forward (two GAT layers; dropout is identity in eval mode)
# --------------------------------------------------------------------------------------------
def node_model_forward(x, adj_i8, W1, a1, W2, a2, *, alpha):
    H, F_in, D = W1.shape
    C = W2.shape[-1]

    # one-off parameter folding (tiny XLA ops): attention projections become weight columns
    w1_cat = jnp.transpose(W1, (1, 0, 2)).reshape(F_in, H * D)          # heads concat on lanes
    w1_dst = jnp.einsum('hfd,hd->fh', W1, a1[:, 0, :])                  # (F_in, H)
    w1_src = jnp.einsum('hfd,hd->fh', W1, a1[:, 1, :])                  # (F_in, H)
    w1_aug = jnp.concatenate([w1_cat, w1_dst, w1_src], axis=-1).astype(jnp.bfloat16)

    # layer 2 (single head): pad the class dim to 128 lanes for a lane-dense final store;
    # the attention folds use the unpadded W2, so padded lanes are exact zeros.
    Cp = ((C + 127) // 128) * 128
    W2_ = W2[0]                                                         # (H*D, C)
    w2_pad = jnp.pad(W2_, ((0, 0), (0, Cp - C)))
    w2_dst = W2_ @ a2[0, 0, :][:, None]                                 # (H*D, 1)
    w2_src = W2_ @ a2[0, 1, :][:, None]                                 # (H*D, 1)
    w2_aug = jnp.concatenate([w2_pad, w2_dst, w2_src], axis=-1).astype(jnp.bfloat16)

    x_bf = x.astype(jnp.bfloat16)
    h1 = gat_layer(x_bf, adj_i8, w1_aug, n_heads=H, d_head=D, alpha=alpha,
                   apply_elu=True, out_dtype=jnp.bfloat16)              # (N, H*D), ELU fused
    h2 = gat_layer(h1, adj_i8, w2_aug, n_heads=1, d_head=Cp, alpha=alpha,
                   apply_elu=False, out_dtype=jnp.float32)              # (N, Cp) lane-dense
    return h2[:, :C]


# --------------------------------------------------------------------------------------------
# Pure-JAX f32 reference of the assumed GAT semantics (sanity check only)
# --------------------------------------------------------------------------------------------
def _gat_layer_ref(x, adj, W, a, alpha):
    outs = []
    for h in range(W.shape[0]):
        wh = x @ W[h]
        f_dst = wh @ a[h, 0]
        f_src = wh @ a[h, 1]
        e = f_dst[:, None] + f_src[None, :]
        e = jnp.where(e > 0, e, alpha * e)
        e = jnp.where(adj > 0, e, -jnp.inf)
        att = jax.nn.softmax(e, axis=-1)
        outs.append(att @ wh)
    return outs


def node_model_ref(x, adj, W1, a1, W2, a2, alpha):
    h1 = jnp.concatenate(_gat_layer_ref(x, adj, W1, a1, alpha), axis=-1)
    h1 = jax.nn.elu(h1)
    return _gat_layer_ref(h1, adj, W2, a2, alpha)[0]


if __name__ == "__main__":
    key = jax.random.PRNGKey(0)
    keys = jax.random.split(key, 6)

    # small config consistent with the module
    N = 8
    d_input = 16
    d_hidden = 8
    n_heads = 4
    nclasses = 4
    alpha = 0.2
    INIT = 0.01          # matches GAT_param_init uniform(-0.01, 0.01)

    # inputs
    x = jax.random.normal(keys[0], (N, d_input), jnp.float32)
    src = jnp.array([0, 1, 2, 3, 4, 5, 6, 7, 0, 2, 4, 6], dtype=jnp.int32)
    dst = jnp.array([1, 2, 3, 0, 5, 6, 7, 4, 2, 0, 6, 4], dtype=jnp.int32)

    # parameters (same distribution as GAT_param_init)
    W1 = jax.random.uniform(keys[1], (n_heads, d_input, d_hidden), jnp.float32, -INIT, INIT)
    a1 = jax.random.uniform(keys[2], (n_heads, 2, d_hidden), jnp.float32, -INIT, INIT)
    W2 = jax.random.uniform(keys[3], (1, d_hidden * n_heads, nclasses), jnp.float32, -INIT, INIT)
    a2 = jax.random.uniform(keys[4], (1, 2, nclasses), jnp.float32, -INIT, INIT)

    # glue: dense int8 adjacency mask (adj[i, j] = 1 iff edge j -> i) plus self-loops.
    # Self-loops keep every masked-softmax row non-empty (denominator > 0).
    adj = jnp.zeros((N, N), jnp.int8)
    adj = adj.at[dst, src].set(1)
    adj = adj.at[jnp.arange(N), jnp.arange(N)].set(1)

    out = node_model_forward(x, adj, W1, a1, W2, a2, alpha=alpha)
    out = jax.block_until_ready(out)
    assert out.shape == (N, nclasses)
    assert bool(jnp.all(jnp.isfinite(out)))

    # loose tolerance: kernel runs bf16 MXU feeds + approx reciprocal vs the f32 reference
    ref = node_model_ref(x, adj, W1, a1, W2, a2, alpha)
    err = float(jnp.max(jnp.abs(out - ref)))
    assert err < 1e-3, f"max abs err vs reference: {err}"
    print("KERNEL_OK")
</pallas_src>

<mosaic_0001>
module attributes {stable_mosaic.version = 11 : i64} {
  func.func @gat_layer_kernel(%arg0: i32, %arg1: i32, %arg2: memref<8x16xbf16, #tpu.memory_space<vmem>>, %arg3: memref<8x16xbf16, #tpu.memory_space<vmem>>, %arg4: memref<16x40xbf16, #tpu.memory_space<vmem>>, %arg5: memref<8x8xi8, #tpu.memory_space<vmem>>, %arg6: memref<8x32xbf16, #tpu.memory_space<vmem>>, %arg7: memref<8x4xf32, #tpu.memory_space<vmem>>, %arg8: memref<4x8x1xf32, #tpu.memory_space<vmem>>, %arg9: memref<4x8x1xf32, #tpu.memory_space<vmem>>, %arg10: memref<4x8x8xf32, #tpu.memory_space<vmem>>) attributes {dimension_semantics = [#tpu.dimension_semantics<parallel>, #tpu.dimension_semantics<arbitrary>], iteration_bounds = array<i64: 1, 1>, scalar_prefetch = 0 : i64, scratch_operands = 4 : i64, tpu.core_type = #tpu.core_type<tc>, window_params = [{transform_indices = @transform_0, window_bounds = array<i64: 8, 16>}, {transform_indices = @transform_1, window_bounds = array<i64: 8, 16>}, {pipeline_mode = #tpu.pipeline_mode<synchronous>, transform_indices = @transform_2, window_bounds = array<i64: 16, 40>}, {transform_indices = @transform_3, window_bounds = array<i64: 8, 8>}, {transform_indices = @transform_4, window_bounds = array<i64: 8, 32>}]} {
    %c0_i32 = arith.constant 0 : i32
    %0 = arith.cmpi eq, %arg1, %c0_i32 : i32
    %1 = arith.extui %0 : i1 to i32
    %cst = arith.constant -1.000000e+30 : f32
    %c0_i32_0 = arith.constant 0 : i32
    %2 = arith.cmpi ne, %1, %c0_i32_0 : i32
    scf.if %2 {
      %c0_109 = arith.constant 0 : index
      %c0_110 = arith.constant 0 : index
      %206 = vector.load %arg2[%c0_109, %c0_110] : memref<8x16xbf16, #tpu.memory_space<vmem>>, vector<8x16xbf16>
      %c0_111 = arith.constant 0 : index
      %c0_112 = arith.constant 0 : index
      %207 = vector.load %arg4[%c0_111, %c0_112] : memref<16x40xbf16, #tpu.memory_space<vmem>>, vector<16x40xbf16>
      %cst_113 = arith.constant dense<0.000000e+00> : vector<8x40xf32>
      %208 = tpu.matmul %206, %207, %cst_113 {dimension_numbers = #tpu.dot_dimension_numbers<[1], [0], [0], [1], [0, 0, 1, 1], [], []>} : vector<8x16xbf16>, vector<16x40xbf16>, vector<8x40xf32> -> vector<8x40xf32>
      %209 = vector.extract_strided_slice %208 {offsets = [0, 32], sizes = [8, 4], strides = [1, 1]} : vector<8x40xf32> to vector<8x4xf32>
      %c0_114 = arith.constant 0 : index
      %c0_115 = arith.constant 0 : index
      %210 = vector.load %arg7[%c0_114, %c0_115] : memref<8x4xf32, #tpu.memory_space<vmem>>, vector<8x4xf32>
      tpu.vector_store %arg7[%c0_114, %c0_115], %209 {strides = array<i32>} : memref<8x4xf32, #tpu.memory_space<vmem>>, vector<8x4xf32>,
      %211 = vector.broadcast %cst : f32 to vector<4x8x1xf32>
      %c0_116 = arith.constant 0 : index
      %c0_117 = arith.constant 0 : index
      %c0_118 = arith.constant 0 : index
      %212 = vector.load %arg8[%c0_116, %c0_117, %c0_118] : memref<4x8x1xf32, #tpu.memory_space<vmem>>, vector<4x8x1xf32>
      tpu.vector_store %arg8[%c0_116, %c0_117, %c0_118], %211 {strides = array<i32>} : memref<4x8x1xf32, #tpu.memory_space<vmem>>, vector<4x8x1xf32>,
      %cst_119 = arith.constant 0.000000e+00 : f32
      %213 = vector.broadcast %cst_119 : f32 to vector<4x8x1xf32>
      %c0_120 = arith.constant 0 : index
      %c0_121 = arith.constant 0 : index
      %c0_122 = arith.constant 0 : index
      %214 = vector.load %arg9[%c0_120, %c0_121, %c0_122] : memref<4x8x1xf32, #tpu.memory_space<vmem>>, vector<4x8x1xf32>
      tpu.vector_store %arg9[%c0_120, %c0_121, %c0_122], %213 {strides = array<i32>} : memref<4x8x1xf32, #tpu.memory_space<vmem>>, vector<4x8x1xf32>,
      %cst_123 = arith.constant 0.000000e+00 : f32
      %215 = vector.broadcast %cst_123 : f32 to vector<4x8x8xf32>
      %c0_124 = arith.constant 0 : index
      %c0_125 = arith.constant 0 : index
      %c0_126 = arith.constant 0 : index
      %216 = vector.load %arg10[%c0_124, %c0_125, %c0_126] : memref<4x8x8xf32, #tpu.memory_space<vmem>>, vector<4x8x8xf32>
      tpu.vector_store %arg10[%c0_124, %c0_125, %c0_126], %215 {strides = array<i32>} : memref<4x8x8xf32, #tpu.memory_space<vmem>>, vector<4x8x8xf32>,
    } else {
    }
    %c0 = arith.constant 0 : index
    %c0_1 = arith.constant 0 : index
    %3 = vector.load %arg5[%c0, %c0_1] : memref<8x8xi8, #tpu.memory_space<vmem>>, vector<8x8xi8>
    %4 = arith.sitofp %3 : vector<8x8xi8> to vector<8x8xf32>
    %cst_2 = arith.constant 0.000000e+00 : f32
    %5 = vector.broadcast %cst_2 : f32 to vector<8x8xf32>
    %6 = arith.cmpf ogt, %4, %5 : vector<8x8xf32>
    %c0_3 = arith.constant 0 : index
    %c0_4 = arith.constant 0 : index
    %7 = vector.load %arg3[%c0_3, %c0_4] : memref<8x16xbf16, #tpu.memory_space<vmem>>, vector<8x16xbf16>
    %c0_5 = arith.constant 0 : index
    %c0_6 = arith.constant 0 : index
    %8 = vector.load %arg4[%c0_5, %c0_6] : memref<16x40xbf16, #tpu.memory_space<vmem>>, vector<16x40xbf16>
    %cst_7 = arith.constant dense<0.000000e+00> : vector<8x40xf32>
    %9 = tpu.matmul %7, %8, %cst_7 {dimension_numbers = #tpu.dot_dimension_numbers<[1], [0], [0], [1], [0, 0, 1, 1], [], []>} : vector<8x16xbf16>, vector<16x40xbf16>, vector<8x40xf32> -> vector<8x40xf32>
    %10 = vector.extract_strided_slice %9 {offsets = [0, 0], sizes = [8, 32], strides = [1, 1]} : vector<8x40xf32> to vector<8x32xf32>
    %11 = arith.truncf %10 : vector<8x32xf32> to vector<8x32xbf16>
    %12 = vector.extract_strided_slice %9 {offsets = [0, 36], sizes = [8, 4], strides = [1, 1]} : vector<8x40xf32> to vector<8x4xf32>
    %13 = tpu.transpose %12, [1, 0] : vector<8x4xf32> -> vector<4x8xf32>
    %c0_8 = arith.constant 0 : index
    %c0_9 = arith.constant 0 : index
    %14 = vector.load %arg7[%c0_8, %c0_9] : memref<8x4xf32, #tpu.memory_space<vmem>>, vector<8x4xf32>
    %15 = vector.extract_strided_slice %14 {offsets = [0, 0], sizes = [8, 1], strides = [1, 1]} : vector<8x4xf32> to vector<8x1xf32>
    %16 = vector.extract_strided_slice %13 {offsets = [0, 0], sizes = [1, 8], strides = [1, 1]} : vector<4x8xf32> to vector<1x8xf32>
    %17 = vector.broadcast %15 : vector<8x1xf32> to vector<8x8xf32>
    %18 = vector.broadcast %16 : vector<1x8xf32> to vector<8x8xf32>
    %19 = arith.addf %17, %18 : vector<8x8xf32>
    %cst_10 = arith.constant 0.000000e+00 : f32
    %20 = vector.broadcast %cst_10 : f32 to vector<8x8xf32>
    %21 = arith.cmpf ogt, %19, %20 : vector<8x8xf32>
    %cst_11 = arith.constant 2.000000e-01 : f32
    %22 = vector.broadcast %cst_11 : f32 to vector<8x8xf32>
    %23 = arith.mulf %22, %19 : vector<8x8xf32>
    %24 = arith.select %21, %19, %23 : vector<8x8xi1>, vector<8x8xf32>
    %cst_12 = arith.constant -1.000000e+30 : f32
    %25 = vector.broadcast %cst_12 : f32 to vector<8x8xf32>
    %26 = arith.select %6, %24, %25 : vector<8x8xi1>, vector<8x8xf32>
    %c0_13 = arith.constant 0 : index
    %c0_14 = arith.constant 0 : index
    %c0_15 = arith.constant 0 : index
    %27 = vector.load %arg8[%c0_13, %c0_14, %c0_15] : memref<4x8x1xf32, #tpu.memory_space<vmem>>, vector<1x8x1xf32>
    %28 = vector.shape_cast %27 : vector<1x8x1xf32> to vector<8x1xf32>
    %cst_16 = arith.constant dense<0xFF800000> : vector<8xf32>
    %29 = vector.multi_reduction <maximumf>, %26, %cst_16 [1] : vector<8x8xf32> to vector<8xf32>
    %30 = vector.shape_cast %29 : vector<8xf32> to vector<8x1xf32>
    %31 = arith.maximumf %28, %30 : vector<8x1xf32>
    %32 = vector.broadcast %31 : vector<8x1xf32> to vector<8x8xf32>
    %33 = arith.subf %26, %32 : vector<8x8xf32>
    %34 = math.exp %33 : vector<8x8xf32>
    %cst_17 = arith.constant 0.000000e+00 : f32
    %35 = vector.broadcast %cst_17 : f32 to vector<8x8xf32>
    %36 = arith.select %6, %34, %35 : vector<8x8xi1>, vector<8x8xf32>
    %37 = arith.subf %28, %31 : vector<8x1xf32>
    %38 = math.exp %37 : vector<8x1xf32>
    %c0_18 = arith.constant 0 : index
    %c0_19 = arith.constant 0 : index
    %c0_20 = arith.constant 0 : index
    %39 = vector.load %arg9[%c0_18, %c0_19, %c0_20] : memref<4x8x1xf32, #tpu.memory_space<vmem>>, vector<1x8x1xf32>
    %40 = vector.shape_cast %39 : vector<1x8x1xf32> to vector<8x1xf32>
    %41 = arith.mulf %38, %40 : vector<8x1xf32>
    %cst_21 = arith.constant dense<0.000000e+00> : vector<8xf32>
    %42 = vector.multi_reduction <add>, %36, %cst_21 [1] : vector<8x8xf32> to vector<8xf32>
    %43 = vector.shape_cast %42 : vector<8xf32> to vector<8x1xf32>
    %44 = arith.addf %41, %43 : vector<8x1xf32>
    %c0_22 = arith.constant 0 : index
    %c0_23 = arith.constant 0 : index
    %c0_24 = arith.constant 0 : index
    %45 = vector.load %arg9[%c0_22, %c0_23, %c0_24] : memref<4x8x1xf32, #tpu.memory_space<vmem>>, vector<1x8x1xf32>
    %46 = vector.shape_cast %45 : vector<1x8x1xf32> to vector<8x1xf32>
    %47 = vector.shape_cast %44 : vector<8x1xf32> to vector<1x8x1xf32>
    tpu.vector_store %arg9[%c0_22, %c0_23, %c0_24], %47 {strides = array<i32>} : memref<4x8x1xf32, #tpu.memory_space<vmem>>, vector<1x8x1xf32>,
    %c0_25 = arith.constant 0 : index
    %c0_26 = arith.constant 0 : index
    %c0_27 = arith.constant 0 : index
    %48 = vector.load %arg10[%c0_25, %c0_26, %c0_27] : memref<4x8x8xf32, #tpu.memory_space<vmem>>, vector<1x8x8xf32>
    %49 = vector.shape_cast %48 : vector<1x8x8xf32> to vector<8x8xf32>
    %50 = vector.broadcast %38 : vector<8x1xf32> to vector<8x8xf32>
    %51 = arith.mulf %50, %49 : vector<8x8xf32>
    %52 = arith.truncf %36 : vector<8x8xf32> to vector<8x8xbf16>
    %53 = vector.extract_strided_slice %11 {offsets = [0, 0], sizes = [8, 8], strides = [1, 1]} : vector<8x32xbf16> to vector<8x8xbf16>
    %cst_28 = arith.constant dense<0.000000e+00> : vector<8x8xf32>
    %54 = tpu.matmul %52, %53, %cst_28 {dimension_numbers = #tpu.dot_dimension_numbers<[1], [0], [0], [1], [0, 0, 1, 1], [], []>} : vector<8x8xbf16>, vector<8x8xbf16>, vector<8x8xf32> -> vector<8x8xf32>
    %55 = arith.addf %51, %54 : vector<8x8xf32>
    %c0_29 = arith.constant 0 : index
    %c0_30 = arith.constant 0 : index
    %c0_31 = arith.constant 0 : index
    %56 = vector.load %arg10[%c0_29, %c0_30, %c0_31] : memref<4x8x8xf32, #tpu.memory_space<vmem>>, vector<1x8x8xf32>
    %57 = vector.shape_cast %56 : vector<1x8x8xf32> to vector<8x8xf32>
    %58 = vector.shape_cast %55 : vector<8x8xf32> to vector<1x8x8xf32>
    tpu.vector_store %arg10[%c0_29, %c0_30, %c0_31], %58 {strides = array<i32>} : memref<4x8x8xf32, #tpu.memory_space<vmem>>, vector<1x8x8xf32>,
    %c0_32 = arith.constant 0 : index
    %c0_33 = arith.constant 0 : index
    %c0_34 = arith.constant 0 : index
    %59 = vector.load %arg8[%c0_32, %c0_33, %c0_34] : memref<4x8x1xf32, #tpu.memory_space<vmem>>, vector<1x8x1xf32>
    %60 = vector.shape_cast %59 : vector<1x8x1xf32> to vector<8x1xf32>
    %61 = vector.shape_cast %31 : vector<8x1xf32> to vector<1x8x1xf32>
    tpu.vector_store %arg8[%c0_32, %c0_33, %c0_34], %61 {strides = array<i32>} : memref<4x8x1xf32, #tpu.memory_space<vmem>>, vector<1x8x1xf32>,
    %62 = vector.extract_strided_slice %14 {offsets = [0, 1], sizes = [8, 1], strides = [1, 1]} : vector<8x4xf32> to vector<8x1xf32>
    %63 = vector.extract_strided_slice %13 {offsets = [1, 0], sizes = [1, 8], strides = [1, 1]} : vector<4x8xf32> to vector<1x8xf32>
    %64 = vector.broadcast %62 : vector<8x1xf32> to vector<8x8xf32>
    %65 = vector.broadcast %63 : vector<1x8xf32> to vector<8x8xf32>
    %66 = arith.addf %64, %65 : vector<8x8xf32>
    %cst_35 = arith.constant 0.000000e+00 : f32
    %67 = vector.broadcast %cst_35 : f32 to vector<8x8xf32>
    %68 = arith.cmpf ogt, %66, %67 : vector<8x8xf32>
    %cst_36 = arith.constant 2.000000e-01 : f32
    %69 = vector.broadcast %cst_36 : f32 to vector<8x8xf32>
    %70 = arith.mulf %69, %66 : vector<8x8xf32>
    %71 = arith.select %68, %66, %70 : vector<8x8xi1>, vector<8x8xf32>
    %cst_37 = arith.constant -1.000000e+30 : f32
    %72 = vector.broadcast %cst_37 : f32 to vector<8x8xf32>
    %73 = arith.select %6, %71, %72 : vector<8x8xi1>, vector<8x8xf32>
    %c1 = arith.constant 1 : index
    %c0_38 = arith.constant 0 : index
    %c0_39 = arith.constant 0 : index
    %74 = vector.load %arg8[%c1, %c0_38, %c0_39] : memref<4x8x1xf32, #tpu.memory_space<vmem>>, vector<1x8x1xf32>
    %75 = vector.shape_cast %74 : vector<1x8x1xf32> to vector<8x1xf32>
    %cst_40 = arith.constant dense<0xFF800000> : vector<8xf32>
    %76 = vector.multi_reduction <maximumf>, %73, %cst_40 [1] : vector<8x8xf32> to vector<8xf32>
    %77 = vector.shape_cast %76 : vector<8xf32> to vector<8x1xf32>
    %78 = arith.maximumf %75, %77 : vector<8x1xf32>
    %79 = vector.broadcast %78 : vector<8x1xf32> to vector<8x8xf32>
    %80 = arith.subf %73, %79 : vector<8x8xf32>
    %81 = math.exp %80 : vector<8x8xf32>
    %cst_41 = arith.constant 0.000000e+00 : f32
    %82 = vector.broadcast %cst_41 : f32 to vector<8x8xf32>
    %83 = arith.select %6, %81, %82 : vector<8x8xi1>, vector<8x8xf32>
    %84 = arith.subf %75, %78 : vector<8x1xf32>
    %85 = math.exp %84 : vector<8x1xf32>
    %c1_42 = arith.constant 1 : index
    %c0_43 = arith.constant 0 : index
    %c0_44 = arith.constant 0 : index
    %86 = vector.load %arg9[%c1_42, %c0_43, %c0_44] : memref<4x8x1xf32, #tpu.memory_space<vmem>>, vector<1x8x1xf32>
    %87 = vector.shape_cast %86 : vector<1x8x1xf32> to vector<8x1xf32>
    %88 = arith.mulf %85, %87 : vector<8x1xf32>
    %cst_45 = arith.constant dense<0.000000e+00> : vector<8xf32>
    %89 = vector.multi_reduction <add>, %83, %cst_45 [1] : vector<8x8xf32> to vector<8xf32>
    %90 = vector.shape_cast %89 : vector<8xf32> to vector<8x1xf32>
    %91 = arith.addf %88, %90 : vector<8x1xf32>
    %c1_46 = arith.constant 1 : index
    %c0_47 = arith.constant 0 : index
    %c0_48 = arith.constant 0 : index
    %92 = vector.load %arg9[%c1_46, %c0_47, %c0_48] : memref<4x8x1xf32, #tpu.memory_space<vmem>>, vector<1x8x1xf32>
    %93 = vector.shape_cast %92 : vector<1x8x1xf32> to vector<8x1xf32>
    %94 = vector.shape_cast %91 : vector<8x1xf32> to vector<1x8x1xf32>
    tpu.vector_store %arg9[%c1_46, %c0_47, %c0_48], %94 {strides = array<i32>} : memref<4x8x1xf32, #tpu.memory_space<vmem>>, vector<1x8x1xf32>,
    %c1_49 = arith.constant 1 : index
    %c0_50 = arith.constant 0 : index
    %c0_51 = arith.constant 0 : index
    %95 = vector.load %arg10[%c1_49, %c0_50, %c0_51] : memref<4x8x8xf32, #tpu.memory_space<vmem>>, vector<1x8x8xf32>
    %96 = vector.shape_cast %95 : vector<1x8x8xf32> to vector<8x8xf32>
    %97 = vector.broadcast %85 : vector<8x1xf32> to vector<8x8xf32>
    %98 = arith.mulf %97, %96 : vector<8x8xf32>
    %99 = arith.truncf %83 : vector<8x8xf32> to vector<8x8xbf16>
    %100 = vector.extract_strided_slice %11 {offsets = [0, 8], sizes = [8, 8], strides = [1, 1]} : vector<8x32xbf16> to vector<8x8xbf16>
    %cst_52 = arith.constant dense<0.000000e+00> : vector<8x8xf32>
    %101 = tpu.matmul %99, %100, %cst_52 {dimension_numbers = #tpu.dot_dimension_numbers<[1], [0], [0], [1], [0, 0, 1, 1], [], []>} : vector<8x8xbf16>, vector<8x8xbf16>, vector<8x8xf32> -> vector<8x8xf32>
    %102 = arith.addf %98, %101 : vector<8x8xf32>
    %c1_53 = arith.constant 1 : index
    %c0_54 = arith.constant 0 : index
    %c0_55 = arith.constant 0 : index
    %103 = vector.load %arg10[%c1_53, %c0_54, %c0_55] : memref<4x8x8xf32, #tpu.memory_space<vmem>>, vector<1x8x8xf32>
    %104 = vector.shape_cast %103 : vector<1x8x8xf32> to vector<8x8xf32>
    %105 = vector.shape_cast %102 : vector<8x8xf32> to vector<1x8x8xf32>
    tpu.vector_store %arg10[%c1_53, %c0_54, %c0_55], %105 {strides = array<i32>} : memref<4x8x8xf32, #tpu.memory_space<vmem>>, vector<1x8x8xf32>,
    %c1_56 = arith.constant 1 : index
    %c0_57 = arith.constant 0 : index
    %c0_58 = arith.constant 0 : index
    %106 = vector.load %arg8[%c1_56, %c0_57, %c0_58] : memref<4x8x1xf32, #tpu.memory_space<vmem>>, vector<1x8x1xf32>
    %107 = vector.shape_cast %106 : vector<1x8x1xf32> to vector<8x1xf32>
    %108 = vector.shape_cast %78 : vector<8x1xf32> to vector<1x8x1xf32>
    tpu.vector_store %arg8[%c1_56, %c0_57, %c0_58], %108 {strides = array<i32>} : memref<4x8x1xf32, #tpu.memory_space<vmem>>, vector<1x8x1xf32>,
    %109 = vector.extract_strided_slice %14 {offsets = [0, 2], sizes = [8, 1], strides = [1, 1]} : vector<8x4xf32> to vector<8x1xf32>
    %110 = vector.extract_strided_slice %13 {offsets = [2, 0], sizes = [1, 8], strides = [1, 1]} : vector<4x8xf32> to vector<1x8xf32>
    %111 = vector.broadcast %109 : vector<8x1xf32> to vector<8x8xf32>
    %112 = vector.broadcast %110 : vector<1x8xf32> to vector<8x8xf32>
    %113 = arith.addf %111, %112 : vector<8x8xf32>
    %cst_59 = arith.constant 0.000000e+00 : f32
    %114 = vector.broadcast %cst_59 : f32 to vector<8x8xf32>
    %115 = arith.cmpf ogt, %113, %114 : vector<8x8xf32>
    %cst_60 = arith.constant 2.000000e-01 : f32
    %116 = vector.broadcast %cst_60 : f32 to vector<8x8xf32>
    %117 = arith.mulf %116, %113 : vector<8x8xf32>
    %118 = arith.select %115, %113, %117 : vector<8x8xi1>, vector<8x8xf32>
    %cst_61 = arith.constant -1.000000e+30 : f32
    %119 = vector.broadcast %cst_61 : f32 to vector<8x8xf32>
    %120 = arith.select %6, %118, %119 : vector<8x8xi1>, vector<8x8xf32>
    %c2 = arith.constant 2 : index
    %c0_62 = arith.constant 0 : index
    %c0_63 = arith.constant 0 : index
    %121 = vector.load %arg8[%c2, %c0_62, %c0_63] : memref<4x8x1xf32, #tpu.memory_space<vmem>>, vector<1x8x1xf32>
    %122 = vector.shape_cast %121 : vector<1x8x1xf32> to vector<8x1xf32>
    %cst_64 = arith.constant dense<0xFF800000> : vector<8xf32>
    %123 = vector.multi_reduction <maximumf>, %120, %cst_64 [1] : vector<8x8xf32> to vector<8xf32>
    %124 = vector.shape_cast %123 : vector<8xf32> to vector<8x1xf32>
    %125 = arith.maximumf %122, %124 : vector<8x1xf32>
    %126 = vector.broadcast %125 : vector<8x1xf32> to vector<8x8xf32>
    %127 = arith.subf %120, %126 : vector<8x8xf32>
    %128 = math.exp %127 : vector<8x8xf32>
    %cst_65 = arith.constant 0.000000e+00 : f32
    %129 = vector.broadcast %cst_65 : f32 to vector<8x8xf32>
    %130 = arith.select %6, %128, %129 : vector<8x8xi1>, vector<8x8xf32>
    %131 = arith.subf %122, %125 : vector<8x1xf32>
    %132 = math.exp %131 : vector<8x1xf32>
    %c2_66 = arith.constant 2 : index
    %c0_67 = arith.constant 0 : index
    %c0_68 = arith.constant 0 : index
    %133 = vector.load %arg9[%c2_66, %c0_67, %c0_68] : memref<4x8x1xf32, #tpu.memory_space<vmem>>, vector<1x8x1xf32>
    %134 = vector.shape_cast %133 : vector<1x8x1xf32> to vector<8x1xf32>
    %135 = arith.mulf %132, %134 : vector<8x1xf32>
    %cst_69 = arith.constant dense<0.000000e+00> : vector<8xf32>
    %136 = vector.multi_reduction <add>, %130, %cst_69 [1] : vector<8x8xf32> to vector<8xf32>
    %137 = vector.shape_cast %136 : vector<8xf32> to vector<8x1xf32>
    %138 = arith.addf %135, %137 : vector<8x1xf32>
    %c2_70 = arith.constant 2 : index
    %c0_71 = arith.constant 0 : index
    %c0_72 = arith.constant 0 : index
    %139 = vector.load %arg9[%c2_70, %c0_71, %c0_72] : memref<4x8x1xf32, #tpu.memory_space<vmem>>, vector<1x8x1xf32>
    %140 = vector.shape_cast %139 : vector<1x8x1xf32> to vector<8x1xf32>
    %141 = vector.shape_cast %138 : vector<8x1xf32> to vector<1x8x1xf32>
    tpu.vector_store %arg9[%c2_70, %c0_71, %c0_72], %141 {strides = array<i32>} : memref<4x8x1xf32, #tpu.memory_space<vmem>>, vector<1x8x1xf32>,
    %c2_73 = arith.constant 2 : index
    %c0_74 = arith.constant 0 : index
    %c0_75 = arith.constant 0 : index
    %142 = vector.load %arg10[%c2_73, %c0_74, %c0_75] : memref<4x8x8xf32, #tpu.memory_space<vmem>>, vector<1x8x8xf32>
    %143 = vector.shape_cast %142 : vector<1x8x8xf32> to vector<8x8xf32>
    %144 = vector.broadcast %132 : vector<8x1xf32> to vector<8x8xf32>
    %145 = arith.mulf %144, %143 : vector<8x8xf32>
    %146 = arith.truncf %130 : vector<8x8xf32> to vector<8x8xbf16>
    %147 = vector.extract_strided_slice %11 {offsets = [0, 16], sizes = [8, 8], strides = [1, 1]} : vector<8x32xbf16> to vector<8x8xbf16>
    %cst_76 = arith.constant dense<0.000000e+00> : vector<8x8xf32>
    %148 = tpu.matmul %146, %147, %cst_76 {dimension_numbers = #tpu.dot_dimension_numbers<[1], [0], [0], [1], [0, 0, 1, 1], [], []>} : vector<8x8xbf16>, vector<8x8xbf16>, vector<8x8xf32> -> vector<8x8xf32>
    %149 = arith.addf %145, %148 : vector<8x8xf32>
    %c2_77 = arith.constant 2 : index
    %c0_78 = arith.constant 0 : index
    %c0_79 = arith.constant 0 : index
    %150 = vector.load %arg10[%c2_77, %c0_78, %c0_79] : memref<4x8x8xf32, #tpu.memory_space<vmem>>, vector<1x8x8xf32>
    %151 = vector.shape_cast %150 : vector<1x8x8xf32> to vector<8x8xf32>
    %152 = vector.shape_cast %149 : vector<8x8xf32> to vector<1x8x8xf32>
    tpu.vector_store %arg10[%c2_77, %c0_78, %c0_79], %152 {strides = array<i32>} : memref<4x8x8xf32, #tpu.memory_space<vmem>>, vector<1x8x8xf32>,
    %c2_80 = arith.constant 2 : index
    %c0_81 = arith.constant 0 : index
    %c0_82 = arith.constant 0 : index
    %153 = vector.load %arg8[%c2_80, %c0_81, %c0_82] : memref<4x8x1xf32, #tpu.memory_space<vmem>>, vector<1x8x1xf32>
    %154 = vector.shape_cast %153 : vector<1x8x1xf32> to vector<8x1xf32>
    %155 = vector.shape_cast %125 : vector<8x1xf32> to vector<1x8x1xf32>
    tpu.vector_store %arg8[%c2_80, %c0_81, %c0_82], %155 {strides = array<i32>} : memref<4x8x1xf32, #tpu.memory_space<vmem>>, vector<1x8x1xf32>,
    %156 = vector.extract_strided_slice %14 {offsets = [0, 3], sizes = [8, 1], strides = [1, 1]} : vector<8x4xf32> to vector<8x1xf32>
    %157 = vector.extract_strided_slice %13 {offsets = [3, 0], sizes = [1, 8], strides = [1, 1]} : vector<4x8xf32> to vector<1x8xf32>
    %158 = vector.broadcast %156 : vector<8x1xf32> to vector<8x8xf32>
    %159 = vector.broadcast %157 : vector<1x8xf32> to vector<8x8xf32>
    %160 = arith.addf %158, %159 : vector<8x8xf32>
    %cst_83 = arith.constant 0.000000e+00 : f32
    %161 = vector.broadcast %cst_83 : f32 to vector<8x8xf32>
    %162 = arith.cmpf ogt, %160, %161 : vector<8x8xf32>
    %cst_84 = arith.constant 2.000000e-01 : f32
    %163 = vector.broadcast %cst_84 : f32 to vector<8x8xf32>
    %164 = arith.mulf %163, %160 : vector<8x8xf32>
    %165 = arith.select %162, %160, %164 : vector<8x8xi1>, vector<8x8xf32>
    %cst_85 = arith.constant -1.000000e+30 : f32
    %166 = vector.broadcast %cst_85 : f32 to vector<8x8xf32>
    %167 = arith.select %6, %165, %166 : vector<8x8xi1>, vector<8x8xf32>
    %c3 = arith.constant 3 : index
    %c0_86 = arith.constant 0 : index
    %c0_87 = arith.constant 0 : index
    %168 = vector.load %arg8[%c3, %c0_86, %c0_87] : memref<4x8x1xf32, #tpu.memory_space<vmem>>, vector<1x8x1xf32>
    %169 = vector.shape_cast %168 : vector<1x8x1xf32> to vector<8x1xf32>
    %cst_88 = arith.constant dense<0xFF800000> : vector<8xf32>
    %170 = vector.multi_reduction <maximumf>, %167, %cst_88 [1] : vector<8x8xf32> to vector<8xf32>
    %171 = vector.shape_cast %170 : vector<8xf32> to vector<8x1xf32>
    %172 = arith.maximumf %169, %171 : vector<8x1xf32>
    %173 = vector.broadcast %172 : vector<8x1xf32> to vector<8x8xf32>
    %174 = arith.subf %167, %173 : vector<8x8xf32>
    %175 = math.exp %174 : vector<8x8xf32>
    %cst_89 = arith.constant 0.000000e+00 : f32
    %176 = vector.broadcast %cst_89 : f32 to vector<8x8xf32>
    %177 = arith.select %6, %175, %176 : vector<8x8xi1>, vector<8x8xf32>
    %178 = arith.subf %169, %172 : vector<8x1xf32>
    %179 = math.exp %178 : vector<8x1xf32>
    %c3_90 = arith.constant 3 : index
    %c0_91 = arith.constant 0 : index
    %c0_92 = arith.constant 0 : index
    %180 = vector.load %arg9[%c3_90, %c0_91, %c0_92] : memref<4x8x1xf32, #tpu.memory_space<vmem>>, vector<1x8x1xf32>
    %181 = vector.shape_cast %180 : vector<1x8x1xf32> to vector<8x1xf32>
    %182 = arith.mulf %179, %181 : vector<8x1xf32>
    %cst_93 = arith.constant dense<0.000000e+00> : vector<8xf32>
    %183 = vector.multi_reduction <add>, %177, %cst_93 [1] : vector<8x8xf32> to vector<8xf32>
    %184 = vector.shape_cast %183 : vector<8xf32> to vector<8x1xf32>
    %185 = arith.addf %182, %184 : vector<8x1xf32>
    %c3_94 = arith.constant 3 : index
    %c0_95 = arith.constant 0 : index
    %c0_96 = arith.constant 0 : index
    %186 = vector.load %arg9[%c3_94, %c0_95, %c0_96] : memref<4x8x1xf32, #tpu.memory_space<vmem>>, vector<1x8x1xf32>
    %187 = vector.shape_cast %186 : vector<1x8x1xf32> to vector<8x1xf32>
    %188 = vector.shape_cast %185 : vector<8x1xf32> to vector<1x8x1xf32>
    tpu.vector_store %arg9[%c3_94, %c0_95, %c0_96], %188 {strides = array<i32>} : memref<4x8x1xf32, #tpu.memory_space<vmem>>, vector<1x8x1xf32>,
    %c3_97 = arith.constant 3 : index
    %c0_98 = arith.constant 0 : index
    %c0_99 = arith.constant 0 : index
    %189 = vector.load %arg10[%c3_97, %c0_98, %c0_99] : memref<4x8x8xf32, #tpu.memory_space<vmem>>, vector<1x8x8xf32>
    %190 = vector.shape_cast %189 : vector<1x8x8xf32> to vector<8x8xf32>
    %191 = vector.broadcast %179 : vector<8x1xf32> to vector<8x8xf32>
    %192 = arith.mulf %191, %190 : vector<8x8xf32>
    %193 = arith.truncf %177 : vector<8x8xf32> to vector<8x8xbf16>
    %194 = vector.extract_strided_slice %11 {offsets = [0, 24], sizes = [8, 8], strides = [1, 1]} : vector<8x32xbf16> to vector<8x8xbf16>
    %cst_100 = arith.constant dense<0.000000e+00> : vector<8x8xf32>
    %195 = tpu.matmul %193, %194, %cst_100 {dimension_numbers = #tpu.dot_dimension_numbers<[1], [0], [0], [1], [0, 0, 1, 1], [], []>} : vector<8x8xbf16>, vector<8x8xbf16>, vector<8x8xf32> -> vector<8x8xf32>
    %196 = arith.addf %192, %195 : vector<8x8xf32>
    %c3_101 = arith.constant 3 : index
    %c0_102 = arith.constant 0 : index
    %c0_103 = arith.constant 0 : index
    %197 = vector.load %arg10[%c3_101, %c0_102, %c0_103] : memref<4x8x8xf32, #tpu.memory_space<vmem>>, vector<1x8x8xf32>
    %198 = vector.shape_cast %197 : vector<1x8x8xf32> to vector<8x8xf32>
    %199 = vector.shape_cast %196 : vector<8x8xf32> to vector<1x8x8xf32>
    tpu.vector_store %arg10[%c3_101, %c0_102, %c0_103], %199 {strides = array<i32>} : memref<4x8x8xf32, #tpu.memory_space<vmem>>, vector<1x8x8xf32>,
    %c3_104 = arith.constant 3 : index
    %c0_105 = arith.constant 0 : index
    %c0_106 = arith.constant 0 : index
    %200 = vector.load %arg8[%c3_104, %c0_105, %c0_106] : memref<4x8x1xf32, #tpu.memory_space<vmem>>, vector<1x8x1xf32>
    %201 = vector.shape_cast %200 : vector<1x8x1xf32> to vector<8x1xf32>
    %202 = vector.shape_cast %172 : vector<8x1xf32> to vector<1x8x1xf32>
    tpu.vector_store %arg8[%c3_104, %c0_105, %c0_106], %202 {strides = array<i32>} : memref<4x8x1xf32, #tpu.memory_space<vmem>>, vector<1x8x1xf32>,
    %c0_i32_107 = arith.constant 0 : i32
    %203 = arith.cmpi eq, %arg1, %c0_i32_107 : i32
    %204 = arith.extui %203 : i1 to i32
    %c0_i32_108 = arith.constant 0 : i32
    %205 = arith.cmpi ne, %204, %c0_i32_108 : i32
    scf.if %205 {
      %c0_109 = arith.constant 0 : index
      %c0_110 = arith.constant 0 : index
      %c0_111 = arith.constant 0 : index
      %206 = vector.load %arg9[%c0_109, %c0_110, %c0_111] : memref<4x8x1xf32, #tpu.memory_space<vmem>>, vector<1x8x1xf32>
      %207 = vector.shape_cast %206 : vector<1x8x1xf32> to vector<8x1xf32>
      %208 = tpu.reciprocal %207 {approx = true} : vector<8x1xf32> -> vector<8x1xf32>
      %c0_112 = arith.constant 0 : index
      %c0_113 = arith.constant 0 : index
      %c0_114 = arith.constant 0 : index
      %209 = vector.load %arg10[%c0_112, %c0_113, %c0_114] : memref<4x8x8xf32, #tpu.memory_space<vmem>>, vector<1x8x8xf32>
      %210 = vector.shape_cast %209 : vector<1x8x8xf32> to vector<8x8xf32>
      %211 = vector.broadcast %208 : vector<8x1xf32> to vector<8x8xf32>
      %212 = arith.mulf %210, %211 : vector<8x8xf32>
      %cst_115 = arith.constant 0.000000e+00 : f32
      %213 = vector.broadcast %cst_115 : f32 to vector<8x8xf32>
      %214 = arith.cmpf ogt, %212, %213 : vector<8x8xf32>
      %cst_116 = arith.constant 0.000000e+00 : f32
      %215 = vector.broadcast %cst_116 : f32 to vector<8x8xf32>
      %216 = arith.minimumf %212, %215 : vector<8x8xf32>
      %217 = math.exp %216 : vector<8x8xf32>
      %cst_117 = arith.constant 1.000000e+00 : f32
      %218 = vector.broadcast %cst_117 : f32 to vector<8x8xf32>
      %219 = arith.subf %217, %218 : vector<8x8xf32>
      %220 = arith.select %214, %212, %219 : vector<8x8xi1>, vector<8x8xf32>
      %221 = arith.truncf %220 : vector<8x8xf32> to vector<8x8xbf16>
      %c0_118 = arith.constant 0 : index
      %c0_119 = arith.constant 0 : index
      %222 = vector.load %arg6[%c0_118, %c0_119] : memref<8x32xbf16, #tpu.memory_space<vmem>>, vector<8x8xbf16>
      tpu.vector_store %arg6[%c0_118, %c0_119], %221 {strides = array<i32>} : memref<8x32xbf16, #tpu.memory_space<vmem>>, vector<8x8xbf16>,
      %c1_120 = arith.constant 1 : index
      %c0_121 = arith.constant 0 : index
      %c0_122 = arith.constant 0 : index
      %223 = vector.load %arg9[%c1_120, %c0_121, %c0_122] : memref<4x8x1xf32, #tpu.memory_space<vmem>>, vector<1x8x1xf32>
      %224 = vector.shape_cast %223 : vector<1x8x1xf32> to vector<8x1xf32>
      %225 = tpu.reciprocal %224 {approx = true} : vector<8x1xf32> -> vector<8x1xf32>
      %c1_123 = arith.constant 1 : index
      %c0_124 = arith.constant 0 : index
      %c0_125 = arith.constant 0 : index
      %226 = vector.load %arg10[%c1_123, %c0_124, %c0_125] : memref<4x8x8xf32, #tpu.memory_space<vmem>>, vector<1x8x8xf32>
      %227 = vector.shape_cast %226 : vector<1x8x8xf32> to vector<8x8xf32>
      %228 = vector.broadcast %225 : vector<8x1xf32> to vector<8x8xf32>
      %229 = arith.mulf %227, %228 : vector<8x8xf32>
      %cst_126 = arith.constant 0.000000e+00 : f32
      %230 = vector.broadcast %cst_126 : f32 to vector<8x8xf32>
      %231 = arith.cmpf ogt, %229, %230 : vector<8x8xf32>
      %cst_127 = arith.constant 0.000000e+00 : f32
      %232 = vector.broadcast %cst_127 : f32 to vector<8x8xf32>
      %233 = arith.minimumf %229, %232 : vector<8x8xf32>
      %234 = math.exp %233 : vector<8x8xf32>
      %cst_128 = arith.constant 1.000000e+00 : f32
      %235 = vector.broadcast %cst_128 : f32 to vector<8x8xf32>
      %236 = arith.subf %234, %235 : vector<8x8xf32>
      %237 = arith.select %231, %229, %236 : vector<8x8xi1>, vector<8x8xf32>
      %238 = arith.truncf %237 : vector<8x8xf32> to vector<8x8xbf16>
      %c0_129 = arith.constant 0 : index
      %c8 = arith.constant 8 : index
      %239 = vector.load %arg6[%c0_129, %c8] : memref<8x32xbf16, #tpu.memory_space<vmem>>, vector<8x8xbf16>
      tpu.vector_store %arg6[%c0_129, %c8], %238 {strides = array<i32>} : memref<8x32xbf16, #tpu.memory_space<vmem>>, vector<8x8xbf16>,
      %c2_130 = arith.constant 2 : index
      %c0_131 = arith.constant 0 : index
      %c0_132 = arith.constant 0 : index
      %240 = vector.load %arg9[%c2_130, %c0_131, %c0_132] : memref<4x8x1xf32, #tpu.memory_space<vmem>>, vector<1x8x1xf32>
      %241 = vector.shape_cast %240 : vector<1x8x1xf32> to vector<8x1xf32>
      %242 = tpu.reciprocal %241 {approx = true} : vector<8x1xf32> -> vector<8x1xf32>
      %c2_133 = arith.constant 2 : index
      %c0_134 = arith.constant 0 : index
      %c0_135 = arith.constant 0 : index
      %243 = vector.load %arg10[%c2_133, %c0_134, %c0_135] : memref<4x8x8xf32, #tpu.memory_space<vmem>>, vector<1x8x8xf32>
      %244 = vector.shape_cast %243 : vector<1x8x8xf32> to vector<8x8xf32>
      %245 = vector.broadcast %242 : vector<8x1xf32> to vector<8x8xf32>
      %246 = arith.mulf %244, %245 : vector<8x8xf32>
      %cst_136 = arith.constant 0.000000e+00 : f32
      %247 = vector.broadcast %cst_136 : f32 to vector<8x8xf32>
      %248 = arith.cmpf ogt, %246, %247 : vector<8x8xf32>
      %cst_137 = arith.constant 0.000000e+00 : f32
      %249 = vector.broadcast %cst_137 : f32 to vector<8x8xf32>
      %250 = arith.minimumf %246, %249 : vector<8x8xf32>
      %251 = math.exp %250 : vector<8x8xf32>
      %cst_138 = arith.constant 1.000000e+00 : f32
      %252 = vector.broadcast %cst_138 : f32 to vector<8x8xf32>
      %253 = arith.subf %251, %252 : vector<8x8xf32>
      %254 = arith.select %248, %246, %253 : vector<8x8xi1>, vector<8x8xf32>
      %255 = arith.truncf %254 : vector<8x8xf32> to vector<8x8xbf16>
      %c0_139 = arith.constant 0 : index
      %c16 = arith.constant 16 : index
      %256 = vector.load %arg6[%c0_139, %c16] : memref<8x32xbf16, #tpu.memory_space<vmem>>, vector<8x8xbf16>
      tpu.vector_store %arg6[%c0_139, %c16], %255 {strides = array<i32>} : memref<8x32xbf16, #tpu.memory_space<vmem>>, vector<8x8xbf16>,
      %c3_140 = arith.constant 3 : index
      %c0_141 = arith.constant 0 : index
      %c0_142 = arith.constant 0 : index
      %257 = vector.load %arg9[%c3_140, %c0_141, %c0_142] : memref<4x8x1xf32, #tpu.memory_space<vmem>>, vector<1x8x1xf32>
      %258 = vector.shape_cast %257 : vector<1x8x1xf32> to vector<8x1xf32>
      %259 = tpu.reciprocal %258 {approx = true} : vector<8x1xf32> -> vector<8x1xf32>
      %c3_143 = arith.constant 3 : index
      %c0_144 = arith.constant 0 : index
      %c0_145 = arith.constant 0 : index
      %260 = vector.load %arg10[%c3_143, %c0_144, %c0_145] : memref<4x8x8xf32, #tpu.memory_space<vmem>>, vector<1x8x8xf32>
      %261 = vector.shape_cast %260 : vector<1x8x8xf32> to vector<8x8xf32>
      %262 = vector.broadcast %259 : vector<8x1xf32> to vector<8x8xf32>
      %263 = arith.mulf %261, %262 : vector<8x8xf32>
      %cst_146 = arith.constant 0.000000e+00 : f32
      %264 = vector.broadcast %cst_146 : f32 to vector<8x8xf32>
      %265 = arith.cmpf ogt, %263, %264 : vector<8x8xf32>
      %cst_147 = arith.constant 0.000000e+00 : f32
      %266 = vector.broadcast %cst_147 : f32 to vector<8x8xf32>
      %267 = arith.minimumf %263, %266 : vector<8x8xf32>
      %268 = math.exp %267 : vector<8x8xf32>
      %cst_148 = arith.constant 1.000000e+00 : f32
      %269 = vector.broadcast %cst_148 : f32 to vector<8x8xf32>
      %270 = arith.subf %268, %269 : vector<8x8xf32>
      %271 = arith.select %265, %263, %270 : vector<8x8xi1>, vector<8x8xf32>
      %272 = arith.truncf %271 : vector<8x8xf32> to vector<8x8xbf16>
      %c0_149 = arith.constant 0 : index
      %c24 = arith.constant 24 : index
      %273 = vector.load %arg6[%c0_149, %c24] : memref<8x32xbf16, #tpu.memory_space<vmem>>, vector<8x8xbf16>
      tpu.vector_store %arg6[%c0_149, %c24], %272 {strides = array<i32>} : memref<8x32xbf16, #tpu.memory_space<vmem>>, vector<8x8xbf16>,
    } else {
    }
    return
  }
  func.func @transform_0(%arg0: i32, %arg1: i32) -> (i32, i32) {
    %c0_i32 = arith.constant 0 : i32
    %c0_i32_0 = arith.constant 0 : i32
    return %arg0, %c0_i32 : i32, i32
  }
  func.func @transform_1(%arg0: i32, %arg1: i32) -> (i32, i32) {
    %c0_i32 = arith.constant 0 : i32
    %c0_i32_0 = arith.constant 0 : i32
    return %arg1, %c0_i32 : i32, i32
  }
  func.func @transform_2(%arg0: i32, %arg1: i32) -> (i32, i32) {
    %c0_i32 = arith.constant 0 : i32
    %c0_i32_0 = arith.constant 0 : i32
    %c0_i32_1 = arith.constant 0 : i32
    return %c0_i32, %c0_i32_0 : i32, i32
  }
  func.func @transform_3(%arg0: i32, %arg1: i32) -> (i32, i32) {
    %c0_i32 = arith.constant 0 : i32
    return %arg0, %arg1 : i32, i32
  }
  func.func @transform_4(%arg0: i32, %arg1: i32) -> (i32, i32) {
    %c0_i32 = arith.constant 0 : i32
    %c0_i32_0 = arith.constant 0 : i32
    return %arg0, %c0_i32 : i32, i32
  }
}

</mosaic_0001>

<bundles_post_ra>
// kernel: tpu_custom_call.1
= control target key start
LH: loop header
LB: loop body
LE: loop exit
PB: predicated region body
PF: predicated region fallthrough
CT: control target
= control target key end

     0   :  { %9 = vsyncpa [#allocation7], 0  ;;  %s914_s0 = inlined_call_operand.hbm [shape: bf16[8,16], index: 0, kind: input, shape index: {}]   ;;  %s915_s1 = inlined_call_operand.hbm [shape: bf16[8,16], index: 1, kind: input, shape index: {}]   ;;  %s916_s2 = inlined_call_operand.hbm [shape: bf16[16,40], index: 2, kind: input, shape index: {}]   ;;  %s917_s3 = inlined_call_operand.vmem [shape: s8[8,8], index: 3, kind: input, shape index: {}]   ;;  %s918_s4 = inlined_call_operand.hbm [shape: bf16[8,32], index: 4, kind: output, shape index: {}]  }
   0x1   :  { %10 = vsyncpa [#allocation10], 0  ;;  %s28_s17 = sshll.u32 %s915_s1, 4  ;;  %s29_s17 = int_to_ptr.hbm [resolvable:$true] %s28_s17 }
   0x2   :  { %11 = vsyncpa [#allocation8], 0  ;;  %s743_s18 = smov [#allocation9]   ;;  %s17_s22 = sshll.u32 %s914_s0, 4  ;;  %s18_s22 = int_to_ptr.hbm [resolvable:$true] %s17_s22 }
   0x3   :  { %s30_s19 = sshll.u32 %s743_s18, 4  ;;  %s744_s23 = smov [#allocation6]   ;;  %s31_s19 = int_to_ptr.vmem [resolvable:$true] %s30_s19 }
   0x4   :  { %33 = dma.hbm_to_vmem [thread:$0]  %s29_s17, 64, %s31_s19, [#allocation10]  }
   0x5   :  { %s19_s24 = sshll.u32 %s744_s23, 4  ;;  %s38_s27 = sshll.u32 %s916_s2, 4  ;;  %s20_s24 = int_to_ptr.vmem [resolvable:$true] %s19_s24  ;;  %s39_s27 = int_to_ptr.hbm [resolvable:$true] %s38_s27 }
   0x6   :  { %22 = dma.hbm_to_vmem [thread:$0]  %s18_s22, 64, %s20_s24, [#allocation7]  }
   0x7   :  { %s745_s1 = smov [#allocation11]   ;;  %s746_s29 = smov 64  }
   0x8   :  { %s40_s28 = sshll.u32 %s745_s1, 4  ;;  %s747_s30 = smov 4   ;;  %s41_s28 = int_to_ptr.vmem [resolvable:$true] %s40_s28 }
   0x9   :  { %46 = dma.hbm_to_vmem [thread:$0]  %s39_s27, 128, %s41_s28, [#allocation10], %s746_s29, %s746_s29, %s747_s30  }
   0xa   :  { %737 = dma.done.wait [#allocation7], 64  }
   0xb   :  { %738 = vsyncadd [#allocation7], 4294967232 }
   0xc   :  { %739 = dma.done.wait [#allocation10], 192  }
   0xd   :  { %740 = vsyncadd [#allocation10], 4294967104  ;;  %v581_v0 = vld [vmem:[#allocation11] sm:$0xff]  ;;  %v66_v2 = vld [vmem:[#allocation6] sm:$0xf]  ;;  %vm75_vm0 = vcmask 130048  }
   0xe   :  { %v582_v1 = vld [vmem:[#allocation11] sm:$0xff]  ;;  %86 = vmatpush.bf16.msra.mxu0 %v581_v0  ;;  %v116_v3 = vld [vmem:[#allocation9] sm:$0xf]  ;;  %vm228_vm1 = vcmask 1043456   ;;  %s748_s0 = smov 96   ;;  %s749_s2 = smov 92  }
   0xf   :  { %136 = vmatpush.bf16.msra.mxu1 %v582_v1  ;;  %v750_v10 = vmov 3   ;;  %v751_v11 = vmov 1   ;;  %v752_v12 = vmov 0   ;;  %vm96_vm2 = vcmask 31744   ;;  %v112_v20 = vld [vmem:[%s917_s3] sm:$0x3] }
  0x10   :  { %605 = vset.pattern.permute.xlu2 %v750_v10  ;;  %603 = vset.pattern.permute.xlu1 %v751_v11  ;;  %v753_v15 = vmov 2   ;;  %vm98_vm3 = vcmask 7168   ;;  %v754_v17 = vmov -1e+30   ;;  %v113_v21 = vunpack.c.0.s8 %v112_v20  ;;  %s756_s3 = smov 120   ;;  %s757_s7 = smov 104  }
  0x11   :  { %567 = vmatmul.msk.bf16.vlgmr.msra.gmra.mxu0 %vm75_vm0, %v66_v2  ;;  %606 = vset.pattern.permute.xlu0 %v752_v12  ;;  %102 = vst.msk [vmem:[#allocation3 + $0x18] sm:$0xff] %vm98_vm3, %v754_v17  ;;  %vm107_vm7 = vcmask 64512   ;;  %v755_v50 = vmov 0.0   ;;  %s758_s8 = smov 112   ;;  %s759_s9 = smov 24   ;;  %vm477_vm14 = vcmask 60416  }
  0x12   :  { %572 = vmatmul.msk.bf16.vlgmr.msra.gmra.mxu1 %vm75_vm0, %v116_v3  ;;  %99 = vst.msk [vmem:[#allocation3] sm:$0xff] %vm98_vm3, %v754_v17  ;;  %v808_v23 = vcvt.s32.f32 %v113_v21  ;;  %s760_s10 = smov 8   ;;  %s761_s11 = smov 16   ;;  %vm499_vm15 = vcmask 126016   ;;  %vm521_vm0 = vcmask 191616  }
  0x13   :  { %100 = vst.msk [vmem:[#allocation3 + $0x8] sm:$0xff] %vm98_vm3, %v754_v17  ;;  %s762_s12 = smov [#allocation12]   ;;  %s552_s16 = sshll.u32 %s918_s4, 4  ;;  %s553_s16 = int_to_ptr.hbm [resolvable:$true] %s552_s16 }
  0x14   :  { %101 = vst.msk [vmem:[#allocation3 + $0x10] sm:$0xff] %vm98_vm3, %v754_v17  ;;  %vm115_vm4 = vcmp.gt.f32.partialorder %v808_v23, 0.0  ;;  %s550_s13 = sshll.u32 %s762_s12, 4  ;;  %s551_s13 = int_to_ptr.vmem [resolvable:$true] %s550_s13 }
  0x15   :  { %109 = vst.msk [vmem:[#allocation5 + $0x8] sm:$0xff] %vm107_vm7, %v755_v50 }
  0x16   :  { %103 = vst.msk [vmem:[#allocation4] sm:$0xff] %vm98_vm3, %v755_v50 }
  0x17   :  { %104 = vst.msk [vmem:[#allocation4 + $0x8] sm:$0xff] %vm98_vm3, %v755_v50 }
  0x18   :  { %105 = vst.msk [vmem:[#allocation4 + $0x10] sm:$0xff] %vm98_vm3, %v755_v50  ;;  %v843_v51 = vld [vmem:[#allocation3 + $0x18] sm:$0xff] }
  0x19   :  { %106 = vst.msk [vmem:[#allocation4 + $0x18] sm:$0xff] %vm98_vm3, %v755_v50  ;;  %v191_v63 = vld [vmem:[#allocation3] sm:$0xff] }
  0x1a   :  { %108 = vst.msk [vmem:[#allocation5] sm:$0xff] %vm107_vm7, %v755_v50  ;;  %v259_v53 = vld [vmem:[#allocation3 + $0x8] sm:$0xff] }
  0x1b   :  { %110 = vst.msk [vmem:[#allocation5 + $0x10] sm:$0xff] %vm107_vm7, %v755_v50  ;;  %v845_v52 = vld [vmem:[#allocation3 + $0x10] sm:$0xff] }
  0x1c   :  { %111 = vst.msk [vmem:[#allocation5 + $0x18] sm:$0xff] %vm107_vm7, %v755_v50 }
  0x1e   :  { %v277_v50 = vld [vmem:[#allocation4 + $0x8] sm:$0xff] }
  0x8e   :  { %v88_v4 = vpop.f32.mrf.mxu0 }
  0x8f   :  { %v138_v5 = vpop.f32.mrf.mxu1  ;;  %93 = vrot.lane.b32.xlu0 %v88_v4, %s748_s0 }
  0x90   :  { %v797_v6 = vpack.c.bf16 %v138_v5, %v138_v5 }
  0x92   :  { %v230_v7 = vsel %vm228_vm1, %v797_v6, 0  ;;  %v294_v62 = vunpack.c.l.b16 %v797_v6 }
  0x93   :  { %239 = vmatpush.bf16.msra.mxu2 %v230_v7 }
  0x94   :  { %v295_v1 = vpack.c.b16 %v294_v62, %v294_v62 }
  0x96   :  { %v90_v8 = vpop.f32.mrf.mxu0 }
  0x97   :  { %v140_v9 = vpop.f32.mrf.mxu1  ;;  %144 = vrot.lane.b32.xlu0 %v138_v5, %s749_s2 }
 0x101   :  { %v94_v13 = vpop.permute.xlu0 %93 }
 0x102   :  { %97 = vst.msk [vmem:[#allocation2] sm:$0xff] %vm96_vm2, %v94_v13 }
 0x109   :  { %v179_v14 = vld [vmem:[#allocation2] sm:$0xff]  ;;  %v145_v16 = vpop.permute.xlu0 %144 }
 0x10a   :  { %182 = vperm.xlu0 %606, %v179_v14   ;;  %390 = vperm.xlu2 %605, %v179_v14  }
 0x10b   :  { %249 = vperm.xlu1 %603, %v179_v14  }
 0x113   :  { %604 = vset.pattern.permute.xlu1 %v753_v15 }
 0x114   :  { %321 = vperm.xlu1 %604, %v179_v14  }
 0x11c   :  { %607 = vset.pattern.permute.xlu1 %v752_v12 }
 0x130   :  { %147 = vxpose.xlu2.b32.start.end [1/1] (short) (narrow) %v145_v16, 8 }
 0x164   :  { %v391_v18 = vpop.permute.xlu2 %390 }
 0x17c   :  { %v183_v29 = vpop.permute.xlu0 %182 }
 0x17d   :  { %v250_v19 = vpop.permute.xlu1 %249 }
 0x186   :  { %v322_v28 = vpop.permute.xlu1 %321 }
 0x192   :  { %608 = vset.pattern.permute.xlu2 %v752_v12 }
 0x1c9   :  { %v163_v22 = vpop.trf.xlu2 }
 0x1ca   :  { %v185_v24 = vperm.slane %v163_v22, 0  ;;  %v252_v25 = vperm.slane %v163_v22, 1  ;;  %v324_v26 = vperm.slane %v163_v22, 2  ;;  %v393_v27 = vperm.slane %v163_v22, 3 }
 0x1cc   :  { %v394_v30 = vadd.f32 %v393_v27, %v391_v18  ;;  %v325_v31 = vadd.f32 %v324_v26, %v322_v28  ;;  %v253_v32 = vadd.f32 %v252_v25, %v250_v19  ;;  %v186_v33 = vadd.f32 %v185_v24, %v183_v29 }
 0x1ce   :  { %vm395_vm5 = vcmp.gt.f32.partialorder %v394_v30, 0.0  ;;  %v396_v34 = vmul.f32 0.2, %v394_v30  ;;  %vm326_vm6 = vcmp.gt.f32.partialorder %v325_v31, 0.0  ;;  %v327_v35 = vmul.f32 0.2, %v325_v31 }
 0x1cf   :  { %vm254_vm8 = vcmp.gt.f32.partialorder %v253_v32, 0.0  ;;  %v255_v36 = vmul.f32 0.2, %v253_v32  ;;  %v188_v42 = vmul.f32 0.2, %v186_v33  ;;  %vm187_vm9 = vcmp.gt.f32.partialorder %v186_v33, 0.0 }
 0x1d0   :  { %v397_v37 = vsel %vm395_vm5, %v394_v30, %v396_v34  ;;  %v328_v38 = vsel %vm326_vm6, %v325_v31, %v327_v35 }
 0x1d1   :  { %v813_v39 = vsel %vm115_vm4, %v397_v37, -1e+30  ;;  %v817_v40 = vsel %vm115_vm4, %v328_v38, -1e+30  ;;  %v256_v41 = vsel %vm254_vm8, %v253_v32, %v255_v36  ;;  %v189_v47 = vsel %vm187_vm9, %v186_v33, %v188_v42 }
 0x1d2   :  { %v401_v43 = vsel %vm107_vm7, %v813_v39, -inf  ;;  %v332_v44 = vsel %vm107_vm7, %v817_v40, -inf  ;;  %v825_v45 = vsel %vm115_vm4, %v256_v41, -1e+30  ;;  %v831_v48 = vsel %vm115_vm4, %v189_v47, -1e+30 }
 0x1d3   :  { %402 = vmax.xlane.f32.xlu2 %v401_v43  ;;  %333 = vmax.xlane.f32.xlu0 %v332_v44  ;;  %v260_v46 = vsel %vm107_vm7, %v825_v45, -inf  ;;  %v193_v49 = vsel %vm107_vm7, %v831_v48, -inf }
 0x1d4   :  { %261 = vmax.xlane.f32.xlu1 %v260_v46 }
 0x1dc   :  { %194 = vmax.xlane.f32.xlu1 %v193_v49  ;;  %v349_v49 = vld [vmem:[#allocation4 + $0x10] sm:$0xff] }
 0x246   :  { %v403_v54 = vpop.xlane.xlu2 %402  ;;  %v334_v55 = vpop.xlane.xlu0 %333 }
 0x247   :  { %v848_v56 = vmax.f32 %v843_v51, %v403_v54  ;;  %v851_v57 = vmax.f32 %v845_v52, %v334_v55  ;;  %v262_v58 = vpop.xlane.xlu1 %261 }
 0x248   :  { %v263_v59 = vmax.f32 %v259_v53, %v262_v58  ;;  %v418_v58 = vld [vmem:[#allocation4 + $0x18] sm:$0xff] }
 0x249   :  { %v414_v60 = vsub.f32 %v843_v51, %v848_v56  ;;  %457 = vst.msk [vmem:[#allocation3 + $0x18] sm:$0xff] %vm98_vm3, %v848_v56  ;;  %v345_v61 = vsub.f32 %v845_v52, %v851_v57  ;;  %338 = vperm.xlu0 %606, %v851_v57  }
 0x24a   :  { %388 = vst.msk [vmem:[#allocation3 + $0x10] sm:$0xff] %vm98_vm3, %v851_v57  ;;  %266 = vperm.xlu1 %607, %v263_v59   ;;  %v273_v3 = vsub.f32 %v259_v53, %v263_v59 }
 0x24b   :  { %319 = vst.msk [vmem:[#allocation3 + $0x8] sm:$0xff] %vm98_vm3, %v263_v59  ;;  %v415_v46 = vmul.f32 1.442695, %v414_v60 }
 0x24c   :  { %v274_v4 = vmul.f32 1.442695, %v273_v3 }
 0x24e   :  { %609 = vpow2.f32 %v274_v4 }
 0x24f   :  { %v195_v0 = vpop.xlane.xlu1 %194 }
 0x250   :  { %v196_v2 = vmax.f32 %v191_v63, %v195_v0 }
 0x251   :  { %296 = vrot.lane.b32.xlu0 %v295_v1, %s756_s3 }
 0x252   :  { %247 = vst.msk [vmem:[#allocation3] sm:$0xff] %vm98_vm3, %v196_v2  ;;  %407 = vperm.xlu1 %607, %v848_v56   ;;  %v206_v5 = vsub.f32 %v191_v63, %v196_v2  ;;  %v357_v63 = vld [vmem:[#allocation5 + $0x10] sm:$0xff] }
 0x254   :  { %v207_v6 = vmul.f32 1.442695, %v206_v5  ;;  %v866_v7 = vpop.eup %609 }
 0x255   :  { %v278_v53 = vmul.f32 %v866_v7, %v277_v50 }
 0x256   :  { %611 = vpow2.f32 %v207_v6 }
 0x259   :  { %434 = vrot.lane.b32.xlu0 %v295_v1, %s757_s7 }
 0x25a   :  { %365 = vrot.lane.b32.xlu1 %v295_v1, %s758_s8 }
 0x25c   :  { %v869_v8 = vpop.eup %611 }
 0x261   :  { %288 = vperm.xlu0 %606, %v866_v7  }
 0x262   :  { %199 = vperm.xlu1 %607, %v196_v2  }
 0x26a   :  { %220 = vperm.xlu1 %607, %v869_v8  }
 0x2bb   :  { %v339_v9 = vpop.permute.xlu0 %338 }
 0x2bc   :  { %v341_v10 = vsub.f32 %v817_v40, %v339_v9  ;;  %v267_v11 = vpop.permute.xlu1 %266 }
 0x2bd   :  { %v269_v12 = vsub.f32 %v825_v45, %v267_v11 }
 0x2be   :  { %v342_v13 = vmul.f32 1.442695, %v341_v10 }
 0x2bf   :  { %v270_v14 = vmul.f32 1.442695, %v269_v12  ;;  %v209_v12 = vld [vmem:[#allocation4] sm:$0xff] }
 0x2c0   :  { %613 = vpow2.f32 %v342_v13  ;;  %v210_v13 = vmul.f32 %v869_v8, %v209_v12 }
 0x2c1   :  { %615 = vpow2.f32 %v270_v14 }
 0x2c3   :  { %v297_v15 = vpop.permute.xlu0 %296 }
 0x2c4   :  { %v408_v16 = vpop.permute.xlu1 %407  ;;  %v302_v17 = vsel %vm228_vm1, %v297_v15, 0 }
 0x2c5   :  { %v410_v18 = vsub.f32 %v813_v39, %v408_v16  ;;  %311 = vmatpush.bf16.msra.mxu3 %v302_v17  ;;  %v346_v39 = vmul.f32 1.442695, %v345_v61  ;;  %v285_v61 = vld [vmem:[#allocation5 + $0x8] sm:$0xff] }
 0x2c6   :  { %v614_v19 = vpop.eup %613 }
 0x2c7   :  { %v616_v20 = vpop.eup %615  ;;  %v411_v21 = vmul.f32 1.442695, %v410_v18  ;;  %v344_v22 = vsel %vm115_vm4, %v614_v19, 0.0 }
 0x2c8   :  { %v351_v24 = vsel %vm107_vm7, %v344_v22, 0.0  ;;  %v272_v25 = vsel %vm115_vm4, %v616_v20, 0.0  ;;  %v364_v33 = vpack.c.bf16 %v344_v22, %v344_v22  ;;  %v217_v22 = vld [vmem:[#allocation5] sm:$0xff] }
 0x2c9   :  { %617 = vpow2.f32 %v411_v21  ;;  %352 = vadd.xlane.f32.xlu2 %v351_v24  ;;  %v279_v26 = vsel %vm107_vm7, %v272_v25, 0.0  ;;  %v292_v27 = vpack.c.bf16 %v272_v25, %v272_v25 }
 0x2ca   :  { %280 = vadd.xlane.f32.xlu1 %v279_v26 }
 0x2cb   :  { %574 = vmatmul.msk.bf16.vlgmr.msra.gmra.mxu3 %vm107_vm7, %v292_v27  ;;  %v435_v28 = vpop.permute.xlu0 %434  ;;  %v426_v27 = vld [vmem:[#allocation5 + $0x18] sm:$0xff] }
 0x2cc   :  { %v366_v29 = vpop.permute.xlu1 %365  ;;  %v440_v30 = vsel %vm228_vm1, %v435_v28, 0 }
 0x2cd   :  { %v371_v31 = vsel %vm228_vm1, %v366_v29, 0  ;;  %449 = vmatpush.bf16.msrb.mxu1 %v440_v30  ;;  %vm543_vm1 = vcmask 257216  }
 0x2ce   :  { %380 = vmatpush.bf16.msrb.mxu0 %v371_v31 }
 0x2cf   :  { %v618_v32 = vpop.eup %617 }
 0x2d0   :  { %v413_v34 = vsel %vm115_vm4, %v618_v32, 0.0 }
 0x2d1   :  { %575 = vmatmul.msk.bf16.vlgmr.msrb.gmra.mxu0 %vm107_vm7, %v364_v33  ;;  %v420_v35 = vsel %vm107_vm7, %v413_v34, 0.0  ;;  %v433_v36 = vpack.c.bf16 %v413_v34, %v413_v34 }
 0x2d2   :  { %421 = vadd.xlane.f32.xlu1 %v420_v35 }
 0x2d3   :  { %576 = vmatmul.msk.bf16.vlgmr.msrb.gmra.mxu1 %vm107_vm7, %v433_v36  ;;  %v289_v62 = vpop.permute.xlu0 %288 }
 0x2d4   :  { %v200_v37 = vpop.permute.xlu1 %199  ;;  %v291_v2 = vmul.f32 %v289_v62, %v285_v61 }
 0x2d5   :  { %v202_v38 = vsub.f32 %v831_v48, %v200_v37 }
 0x2d7   :  { %v203_v40 = vmul.f32 1.442695, %v202_v38 }
 0x2d9   :  { %619 = vpow2.f32 %v203_v40 }
 0x2da   :  { %621 = vpow2.f32 %v346_v39 }
 0x2db   :  { %623 = vpow2.f32 %v415_v46 }
 0x2dc   :  { %v221_v48 = vpop.permute.xlu1 %220 }
 0x2dd   :  { %v223_v24 = vmul.f32 %v221_v48, %v217_v22 }
 0x2df   :  { %v620_v41 = vpop.eup %619 }
 0x2e0   :  { %v622_v42 = vpop.eup %621  ;;  %v205_v43 = vsel %vm115_vm4, %v620_v41, 0.0 }
 0x2e1   :  { %360 = vperm.xlu2 %608, %v622_v42   ;;  %v211_v44 = vsel %vm107_vm7, %v205_v43, 0.0  ;;  %v224_v45 = vpack.c.bf16 %v205_v43, %v205_v43  ;;  %v624_v47 = vpop.eup %623  ;;  %v350_v52 = vmul.f32 %v622_v42, %v349_v49 }
 0x2e2   :  { %212 = vadd.xlane.f32.xlu0 %v211_v44  ;;  %v419_v51 = vmul.f32 %v624_v47, %v418_v58 }
 0x2e3   :  { %573 = vmatmul.msk.bf16.vlgmr.msra.gmra.mxu2 %vm107_vm7, %v224_v45 }
 0x2f6   :  { %429 = vperm.xlu0 %606, %v624_v47  }
 0x33c   :  { %v353_v23 = vpop.xlane.xlu2 %352 }
 0x33d   :  { %v354_v54 = vadd.f32 %v353_v23, %v350_v52  ;;  %v281_v55 = vpop.xlane.xlu1 %280 }
 0x33e   :  { %v282_v57 = vadd.f32 %v281_v55, %v278_v53 }
 0x33f   :  { %355 = vst.msk [vmem:[#allocation4 + $0x10] sm:$0xff] %vm98_vm3, %v354_v54 }
 0x340   :  { %283 = vst.msk [vmem:[#allocation4 + $0x8] sm:$0xff] %vm98_vm3, %v282_v57 }
 0x344   :  { %v361_v0 = vpop.permute.xlu2 %360 }
 0x345   :  { %v422_v56 = vpop.xlane.xlu1 %421  ;;  %v363_v3 = vmul.f32 %v361_v0, %v357_v63 }
 0x346   :  { %v423_v59 = vadd.f32 %v422_v56, %v419_v51  ;;  %v501_v1 = vld [vmem:[#allocation4 + $0x10] sm:$0xff] }
 0x347   :  { %v479_v60 = vld [vmem:[#allocation4 + $0x8] sm:$0xff] }
 0x348   :  { %424 = vst.msk [vmem:[#allocation4 + $0x18] sm:$0xff] %vm98_vm3, %v423_v59  ;;  %625 = vrcp.f32 %v479_v60 }
 0x349   :  { %627 = vrcp.f32 %v501_v1 }
 0x34e   :  { %v626_v4 = vpop.eup %625  ;;  %v313_v5 = vpop.f32.mrf.mxu3 }
 0x34f   :  { %v382_v6 = vpop.f32.mrf.mxu0  ;;  %v317_v7 = vadd.f32 %v313_v5, %v291_v2  ;;  %484 = vperm.xlu0 %606, %v626_v4   ;;  %v523_v10 = vld [vmem:[#allocation4 + $0x18] sm:$0xff]  ;;  %v628_v14 = vpop.eup %627 }
 0x350   :  { %v386_v9 = vadd.f32 %v382_v6, %v363_v3  ;;  %v451_v11 = vpop.f32.mrf.mxu1  ;;  %629 = vrcp.f32 %v523_v10 }
 0x351   :  { %318 = vst.msk [vmem:[#allocation5 + $0x8] sm:$0xff] %vm107_vm7, %v317_v7 }
 0x352   :  { %387 = vst.msk [vmem:[#allocation5 + $0x10] sm:$0xff] %vm107_vm7, %v386_v9 }
 0x355   :  { %v213_v15 = vpop.xlane.xlu0 %212 }
 0x356   :  { %v630_v16 = vpop.eup %629  ;;  %v214_v17 = vadd.f32 %v213_v15, %v210_v13  ;;  %v315_v18 = vpop.f32.mrf.mxu3 }
 0x357   :  { %v384_v19 = vpop.f32.mrf.mxu0  ;;  %506 = vperm.xlu0 %606, %v628_v14   ;;  %528 = vperm.xlu2 %608, %v630_v16  }
 0x358   :  { %216 = vst.msk [vmem:[#allocation4] sm:$0xff] %vm98_vm3, %v214_v17  ;;  %v453_v20 = vpop.f32.mrf.mxu1  ;;  %v481_v39 = vld [vmem:[#allocation5 + $0x8] sm:$0xff] }
 0x359   :  { %v503_v47 = vld [vmem:[#allocation5 + $0x10] sm:$0xff] }
 0x35f   :  { %v461_v21 = vld [vmem:[#allocation4] sm:$0xff] }
 0x360   :  { %631 = vrcp.f32 %v461_v21 }
 0x366   :  { %v632_v25 = vpop.eup %631  ;;  %v241_v26 = vpop.f32.mrf.mxu2 }
 0x367   :  { %v245_v28 = vadd.f32 %v241_v26, %v223_v24  ;;  %466 = vperm.xlu1 %607, %v632_v25  }
 0x368   :  { %v430_v8 = vpop.permute.xlu0 %429 }
 0x369   :  { %246 = vst.msk [vmem:[#allocation5] sm:$0xff] %vm107_vm7, %v245_v28  ;;  %v432_v29 = vmul.f32 %v430_v8, %v426_v27 }
 0x36b   :  { %v455_v30 = vadd.f32 %v451_v11, %v432_v29 }
 0x36d   :  { %456 = vst.msk [vmem:[#allocation5 + $0x18] sm:$0xff] %vm107_vm7, %v455_v30 }
 0x36e   :  { %v243_v31 = vpop.f32.mrf.mxu2 }
 0x370   :  { %v463_v58 = vld [vmem:[#allocation5] sm:$0xff] }
 0x374   :  { %v525_v32 = vld [vmem:[#allocation5 + $0x18] sm:$0xff] }
 0x3b1   :  { %v529_v33 = vpop.permute.xlu2 %528 }
 0x3b2   :  { %v531_v34 = vmul.f32 %v529_v33, %v525_v32 }
 0x3b4   :  { %v533_v35 = vmin.f32 %v531_v34, 0.0  ;;  %vm532_vm10 = vcmp.gt.f32.partialorder %v531_v34, 0.0 }
 0x3b6   :  { %v534_v36 = vmul.f32 1.442695, %v533_v35 }
 0x3b8   :  { %633 = vpow2.f32 %v534_v36 }
 0x3be   :  { %v634_v37 = vpop.eup %633 }
 0x3bf   :  { %v580_v38 = vadd.f32 -1.0, %v634_v37 }
 0x3c1   :  { %v485_v40 = vpop.permute.xlu0 %484  ;;  %v537_v41 = vsel %vm532_vm10, %v531_v34, %v580_v38 }
 0x3c2   :  { %v487_v42 = vmul.f32 %v485_v40, %v481_v39  ;;  %v538_v43 = vpack.c.bf16 %v537_v41, %v537_v41 }
 0x3c4   :  { %v489_v44 = vmin.f32 %v487_v42, 0.0  ;;  %540 = vrot.lane.b32.xlu2 %v538_v43, %s759_s9  ;;  %vm488_vm11 = vcmp.gt.f32.partialorder %v487_v42, 0.0 }
 0x3c6   :  { %v490_v45 = vmul.f32 1.442695, %v489_v44 }
 0x3c8   :  { %635 = vpow2.f32 %v490_v45 }
 0x3c9   :  { %v507_v46 = vpop.permute.xlu0 %506 }
 0x3ca   :  { %v509_v48 = vmul.f32 %v507_v46, %v503_v47 }
 0x3cc   :  { %v511_v49 = vmin.f32 %v509_v48, 0.0  ;;  %vm510_vm12 = vcmp.gt.f32.partialorder %v509_v48, 0.0 }
 0x3ce   :  { %v636_v50 = vpop.eup %635  ;;  %v512_v52 = vmul.f32 1.442695, %v511_v49 }
 0x3cf   :  { %v578_v23 = vadd.f32 -1.0, %v636_v50 }
 0x3d0   :  { %637 = vpow2.f32 %v512_v52 }
 0x3d1   :  { %v493_v53 = vsel %vm488_vm11, %v487_v42, %v578_v23 }
 0x3d2   :  { %v494_v54 = vpack.c.bf16 %v493_v53, %v493_v53 }
 0x3d4   :  { %496 = vrot.lane.b32.xlu0 %v494_v54, %s760_s10 }
 0x3d6   :  { %v638_v55 = vpop.eup %637 }
 0x3d7   :  { %v579_v57 = vadd.f32 -1.0, %v638_v55 }
 0x3d9   :  { %v467_v51 = vpop.permute.xlu1 %466  ;;  %v515_v56 = vsel %vm510_vm12, %v509_v48, %v579_v57 }
 0x3da   :  { %v469_v59 = vmul.f32 %v467_v51, %v463_v58  ;;  %v516_v60 = vpack.c.bf16 %v515_v56, %v515_v56 }
 0x3dc   :  { %v471_v61 = vmin.f32 %v469_v59, 0.0  ;;  %518 = vrot.lane.b32.xlu1 %v516_v60, %s761_s11  ;;  %vm470_vm13 = vcmp.gt.f32.partialorder %v469_v59, 0.0 }
 0x3de   :  { %v472_v62 = vmul.f32 1.442695, %v471_v61 }
 0x3e0   :  { %639 = vpow2.f32 %v472_v62 }
 0x3e6   :  { %v640_v63 = vpop.eup %639 }
 0x3e7   :  { %v577_v0 = vadd.f32 -1.0, %v640_v63 }
 0x3e9   :  { %v475_v1 = vsel %vm470_vm13, %v469_v59, %v577_v0 }
 0x3ea   :  { %v476_v2 = vpack.c.bf16 %v475_v1, %v475_v1 }
 0x3ec   :  { %478 = vst.msk [vmem:[#allocation12] sm:$0xf] %vm477_vm14, %v476_v2 }
 0x41e   :  { %v541_v5 = vpop.permute.xlu2 %540 }
 0x446   :  { %v497_v3 = vpop.permute.xlu0 %496 }
 0x447   :  { %500 = vst.msk [vmem:[#allocation12] sm:$0xf] %vm499_vm15, %v497_v3 }
 0x44e   :  { %v519_v4 = vpop.permute.xlu1 %518 }
 0x44f   :  { %522 = vst.msk [vmem:[#allocation12] sm:$0xf] %vm521_vm0, %v519_v4 }
 0x450   :  { %544 = vst.msk [vmem:[#allocation12] sm:$0xf] %vm543_vm1, %v541_v5 }
 0x451   :  { %555 = dma.vmem_to_hbm [thread:$0]  %s551_s13, 64, %s553_s16, [#allocation8]  }
 0x452   :  { %741 = dma.done.wait [#allocation8], 64  }
 0x453   :  { %742 = vsyncadd [#allocation8], 4294967232 }
 0x454   :  { %560 = vsyncpa [#allocation7], 1 }
 0x455   :  { %561 = vsyncpa [#allocation10], 1 }
 0x456   :  { %562 = vsyncpa [#allocation8], 1 }

</bundles_post_ra>
